<compile_context>
chip_gen: v5e
topology: v5e:2x2
jax: 0.10.0
libtpu: 0.0.40
codegen_flags: <defaults>
</compile_context>

<pallas_src>
import functools

import jax
import jax.numpy as jnp
from jax.experimental import pallas as pl
from jax.experimental.pallas import tpu as pltpu


def _rbb_kernel(x_ref, w1_ref, b1_ref, w2_ref, b2_ref, w3_ref, b3_ref,
                wsk_ref, bsk_ref, o_ref, *, H, W, skip_is_identity):
    f32 = jnp.float32
    HW = H * W
    cmid = w1_ref.shape[0]

    x = x_ref[0]                                               # (Cin, HW)

    # ---- skip path -----------------------------------------------------
    if skip_is_identity:
        identity = x.astype(f32)
    else:
        identity = jnp.dot(wsk_ref[...], x,
                           preferred_element_type=f32) + bsk_ref[...]

    # ---- conv1 (1x1) + ReLU ---------------------------------------------
    t = jnp.dot(w1_ref[...], x, preferred_element_type=f32) + b1_ref[...]
    t = jnp.maximum(t, 0.0)                                    # (Cmid, HW) f32

    # ---- conv2 (3x3, padding=1) + ReLU ------------------------------------
    # Zero-pad the flattened spatial axis by W+1 on each side so that every
    # tap is the contiguous slice at flat shift s = (di-1)*W + (dj-1).
    # Horizontal edge wrap-around is fixed with per-column masks (w==0 /
    # w==W-1); vertical out-of-range reads land in the zero padding.
    pad = jnp.zeros((cmid, W + 1), f32)
    tz = jnp.concatenate([pad, t, pad], axis=1)                # (Cmid, HW+2W+2)

    col = jax.lax.broadcasted_iota(jnp.int32, (1, HW), 1) % W
    not_first_col = (col != 0).astype(f32)                     # mask for dj == 0
    not_last_col = (col != (W - 1)).astype(f32)                # mask for dj == 2

    taps = []
    for di in range(3):
        for dj in range(3):
            start = (W + 1) + (di - 1) * W + (dj - 1)
            tap = tz[:, start:start + HW]                      # (Cmid, HW)
            if dj == 0:
                tap = tap * not_first_col
            elif dj == 2:
                tap = tap * not_last_col
            taps.append(tap)
    patches = jnp.concatenate(taps, axis=0)                    # (9*Cmid, HW)

    t = jnp.dot(w2_ref[...], patches,
                preferred_element_type=f32) + b2_ref[...]
    t = jnp.maximum(t, 0.0)                                    # (Cmid, HW)

    # ---- conv3 (1x1) -----------------------------------------------------
    y = jnp.dot(w3_ref[...], t, preferred_element_type=f32) + b3_ref[...]

    # ---- residual add + lane-dense store ----------------------------------
    o_ref[0] = (y + identity).astype(o_ref.dtype)              # (Cout, HW)


def residual_bottleneck_block(x_nchw, kparams, *, skip_is_identity=False):
    """x_nchw: (N, Cin, H, W) -> (N, Cout, H, W), matching the PyTorch module."""
    N, Cin, H, W = x_nchw.shape
    Cmid = kparams["w1"].shape[0]
    Cout = kparams["w3"].shape[0]
    HW = H * W

    # NCHW -> (N, Cin, H*W): pure reshape, no data movement.
    x = x_nchw.reshape(N, Cin, HW)

    kernel = functools.partial(_rbb_kernel, H=H, W=W,
                               skip_is_identity=skip_is_identity)

    def resident(shape):
        nd = len(shape)
        return pl.BlockSpec(shape, lambda n, _nd=nd: (0,) * _nd)

    grid_spec = pltpu.PrefetchScalarGridSpec(
        num_scalar_prefetch=0,
        grid=(N,),
        in_specs=[
            pl.BlockSpec((1, Cin, HW), lambda n: (n, 0, 0)),   # x
            resident((Cmid, Cin)), resident((Cmid, 1)),        # conv1 w, b
            resident((Cmid, 9 * Cmid)), resident((Cmid, 1)),   # conv2 w, b (im2col)
            resident((Cout, Cmid)), resident((Cout, 1)),       # conv3 w, b
            resident((Cout, Cin)), resident((Cout, 1)),        # skip  w, b
        ],
        out_specs=pl.BlockSpec((1, Cout, HW), lambda n: (n, 0, 0)),
    )

    out = pl.pallas_call(
        kernel,
        out_shape=jax.ShapeDtypeStruct((N, Cout, HW), x_nchw.dtype),
        grid_spec=grid_spec,
        compiler_params=pltpu.CompilerParams(
            dimension_semantics=("parallel",)),
    )(x, kparams["w1"], kparams["b1"], kparams["w2"], kparams["b2"],
      kparams["w3"], kparams["b3"], kparams["wsk"], kparams["bsk"])

    # (N, Cout, H*W) -> NCHW: pure reshape.
    return out.reshape(N, Cout, H, W)


# ---------------- parameter setup (deterministic, PyTorch layouts) ------------

def init_params_pt(key, in_ch, out_ch, dtype=jnp.float32):
    """Weights in PyTorch Conv2d layout (O, I, kH, kW); biases (O,)."""
    mid_ch = min(in_ch, out_ch) // 2
    ks = jax.random.split(key, 8)

    def conv_w(k, o, i, kh, kw):
        fan_in = i * kh * kw
        return jax.random.normal(k, (o, i, kh, kw), dtype) / jnp.sqrt(float(fan_in))

    p = {
        "w1": conv_w(ks[0], mid_ch, in_ch, 1, 1),
        "b1": 0.1 * jax.random.normal(ks[1], (mid_ch,), dtype),
        "w2": conv_w(ks[2], mid_ch, mid_ch, 3, 3),
        "b2": 0.1 * jax.random.normal(ks[3], (mid_ch,), dtype),
        "w3": conv_w(ks[4], out_ch, mid_ch, 1, 1),
        "b3": 0.1 * jax.random.normal(ks[5], (out_ch,), dtype),
    }
    if in_ch != out_ch:
        p["wsk"] = conv_w(ks[6], out_ch, in_ch, 1, 1)
        p["bsk"] = 0.1 * jax.random.normal(ks[7], (out_ch,), dtype)
    else:
        # nn.Identity() skip: kernel bypasses it via a static flag; keep
        # placeholder tensors so the call signature stays uniform.
        p["wsk"] = jnp.eye(out_ch, dtype=dtype)[:, :, None, None]
        p["bsk"] = jnp.zeros((out_ch,), dtype)
    return p


def to_kernel_params(pt):
    """PyTorch layouts -> channels-first kernel layouts.

    1x1 weights stay (O, I); the 3x3 weight is flattened to (O, 9*I) with
    column index (di*3 + dj)*I + i to match the in-kernel im2col tap order.
    Biases become (O, 1) so they broadcast over the lane (HW) axis.
    """
    o2, i2 = pt["w2"].shape[0], pt["w2"].shape[1]
    return {
        "w1": pt["w1"][:, :, 0, 0],                                   # (Cmid, Cin)
        "b1": pt["b1"][:, None],
        "w2": jnp.transpose(pt["w2"], (0, 2, 3, 1)).reshape(o2, 9 * i2),  # (Cmid, 9*Cmid)
        "b2": pt["b2"][:, None],
        "w3": pt["w3"][:, :, 0, 0],                                   # (Cout, Cmid)
        "b3": pt["b3"][:, None],
        "wsk": pt["wsk"][:, :, 0, 0],                                 # (Cout, Cin)
        "bsk": pt["bsk"][:, None],
    }


# ---------------- pure-JAX reference (NCHW, mirrors the PyTorch forward) ------

def ref_forward(x, pt):
    def conv(inp, w, b, pad):
        y = jax.lax.conv_general_dilated(
            inp, w, window_strides=(1, 1), padding=[(pad, pad), (pad, pad)],
            dimension_numbers=("NCHW", "OIHW", "NCHW"))
        return y + b[None, :, None, None]

    identity = conv(x, pt["wsk"], pt["bsk"], 0)
    t = jax.nn.relu(conv(x, pt["w1"], pt["b1"], 0))
    t = jax.nn.relu(conv(t, pt["w2"], pt["b2"], 1))
    t = conv(t, pt["w3"], pt["b3"], 0)
    return t + identity


if __name__ == "__main__":
    key = jax.random.PRNGKey(0)
    kx, kp = jax.random.split(key)

    N, in_ch, out_ch, H, W = 2, 4, 8, 16, 16          # mid_ch = min(4, 8)//2 = 2
    x = jax.random.normal(kx, (N, in_ch, H, W), jnp.float32)

    pt_params = init_params_pt(kp, in_ch, out_ch)
    kparams = to_kernel_params(pt_params)

    out = residual_bottleneck_block(x, kparams,
                                    skip_is_identity=(in_ch == out_ch))
    out = jax.block_until_ready(out)

    ref = ref_forward(x, pt_params)
    assert out.shape == (N, out_ch, H, W), out.shape
    err = float(jnp.max(jnp.abs(out - ref)))
    assert jnp.allclose(out, ref, atol=1e-4, rtol=1e-4), f"max abs err={err}"

    print("KERNEL_OK")
</pallas_src>

<mosaic_0001>
module attributes {stable_mosaic.version = 11 : i64} {
  func.func @_rbb_kernel(%arg0: i32, %arg1: memref<1x4x256xf32, #tpu.memory_space<vmem>>, %arg2: memref<2x4xf32, #tpu.memory_space<vmem>>, %arg3: memref<2x1xf32, #tpu.memory_space<vmem>>, %arg4: memref<2x18xf32, #tpu.memory_space<vmem>>, %arg5: memref<2x1xf32, #tpu.memory_space<vmem>>, %arg6: memref<8x2xf32, #tpu.memory_space<vmem>>, %arg7: memref<8x1xf32, #tpu.memory_space<vmem>>, %arg8: memref<8x4xf32, #tpu.memory_space<vmem>>, %arg9: memref<8x1xf32, #tpu.memory_space<vmem>>, %arg10: memref<1x8x256xf32, #tpu.memory_space<vmem>>) attributes {dimension_semantics = [#tpu.dimension_semantics<parallel>], iteration_bounds = array<i64: 2>, scalar_prefetch = 0 : i64, scratch_operands = 0 : i64, tpu.core_type = #tpu.core_type<tc>, window_params = [{transform_indices = @transform_0, window_bounds = array<i64: 1, 4, 256>}, {pipeline_mode = #tpu.pipeline_mode<synchronous>, transform_indices = @transform_1, window_bounds = array<i64: 2, 4>}, {pipeline_mode = #tpu.pipeline_mode<synchronous>, transform_indices = @transform_2, window_bounds = array<i64: 2, 1>}, {pipeline_mode = #tpu.pipeline_mode<synchronous>, transform_indices = @transform_3, window_bounds = array<i64: 2, 18>}, {pipeline_mode = #tpu.pipeline_mode<synchronous>, transform_indices = @transform_4, window_bounds = array<i64: 2, 1>}, {pipeline_mode = #tpu.pipeline_mode<synchronous>, transform_indices = @transform_5, window_bounds = array<i64: 8, 2>}, {pipeline_mode = #tpu.pipeline_mode<synchronous>, transform_indices = @transform_6, window_bounds = array<i64: 8, 1>}, {pipeline_mode = #tpu.pipeline_mode<synchronous>, transform_indices = @transform_7, window_bounds = array<i64: 8, 4>}, {pipeline_mode = #tpu.pipeline_mode<synchronous>, transform_indices = @transform_8, window_bounds = array<i64: 8, 1>}, {transform_indices = @transform_9, window_bounds = array<i64: 1, 8, 256>}]} {
    %c0 = arith.constant 0 : index
    %c0_0 = arith.constant 0 : index
    %c0_1 = arith.constant 0 : index
    %0 = vector.load %arg1[%c0, %c0_0, %c0_1] : memref<1x4x256xf32, #tpu.memory_space<vmem>>, vector<1x4x256xf32>
    %1 = vector.shape_cast %0 : vector<1x4x256xf32> to vector<4x256xf32>
    %c0_2 = arith.constant 0 : index
    %c0_3 = arith.constant 0 : index
    %2 = vector.load %arg8[%c0_2, %c0_3] : memref<8x4xf32, #tpu.memory_space<vmem>>, vector<8x4xf32>
    %cst = arith.constant dense<0.000000e+00> : vector<8x256xf32>
    %3 = tpu.matmul %2, %1, %cst {dimension_numbers = #tpu.dot_dimension_numbers<[1], [0], [0], [1], [0, 0, 1, 1], [], []>} : vector<8x4xf32>, vector<4x256xf32>, vector<8x256xf32> -> vector<8x256xf32>
    %c0_4 = arith.constant 0 : index
    %c0_5 = arith.constant 0 : index
    %4 = vector.load %arg9[%c0_4, %c0_5] : memref<8x1xf32, #tpu.memory_space<vmem>>, vector<8x1xf32>
    %5 = vector.broadcast %4 : vector<8x1xf32> to vector<8x256xf32>
    %6 = arith.addf %3, %5 : vector<8x256xf32>
    %c0_6 = arith.constant 0 : index
    %c0_7 = arith.constant 0 : index
    %7 = vector.load %arg2[%c0_6, %c0_7] : memref<2x4xf32, #tpu.memory_space<vmem>>, vector<2x4xf32>
    %cst_8 = arith.constant dense<0.000000e+00> : vector<2x256xf32>
    %8 = tpu.matmul %7, %1, %cst_8 {dimension_numbers = #tpu.dot_dimension_numbers<[1], [0], [0], [1], [0, 0, 1, 1], [], []>} : vector<2x4xf32>, vector<4x256xf32>, vector<2x256xf32> -> vector<2x256xf32>
    %c0_9 = arith.constant 0 : index
    %c0_10 = arith.constant 0 : index
    %9 = vector.load %arg3[%c0_9, %c0_10] : memref<2x1xf32, #tpu.memory_space<vmem>>, vector<2x1xf32>
    %10 = vector.broadcast %9 : vector<2x1xf32> to vector<2x256xf32>
    %11 = arith.addf %8, %10 : vector<2x256xf32>
    %cst_11 = arith.constant 0.000000e+00 : f32
    %12 = vector.broadcast %cst_11 : f32 to vector<2x256xf32>
    %13 = arith.maximumf %11, %12 : vector<2x256xf32>
    %cst_12 = arith.constant 0.000000e+00 : f32
    %14 = vector.broadcast %cst_12 : f32 to vector<2x17xf32>
    %15 = tpu.concatenate %14, %13, %14 in 1 : vector<2x17xf32>, vector<2x256xf32>, vector<2x17xf32> -> vector<2x290xf32>
    %16 = tpu.iota {dimensions = array<i32: 1>} : vector<1x256xi32>
    %c16_i32 = arith.constant 16 : i32
    %c0_i32 = arith.constant 0 : i32
    %17 = arith.cmpi eq, %c16_i32, %c0_i32 : i32
    %c1_i32 = arith.constant 1 : i32
    %18 = arith.select %17, %c1_i32, %c16_i32 : i32
    %19 = vector.broadcast %18 : i32 to vector<1x256xi32>
    %20 = arith.remsi %16, %19 : vector<1x256xi32>
    %c0_i32_13 = arith.constant 0 : i32
    %21 = vector.broadcast %c0_i32_13 : i32 to vector<1x256xi32>
    %22 = arith.cmpi ne, %20, %21 : vector<1x256xi32>
    %c0_i32_14 = arith.constant 0 : i32
    %23 = vector.broadcast %c0_i32_14 : i32 to vector<1x256xi32>
    %24 = arith.cmpi slt, %20, %23 : vector<1x256xi32>
    %c0_i32_15 = arith.constant 0 : i32
    %25 = arith.cmpi slt, %18, %c0_i32_15 : i32
    %26 = vector.broadcast %25 : i1 to vector<1x256xi1>
    %27 = vector.broadcast %26 : vector<1x256xi1> to vector<1x256xi1>
    %28 = arith.xori %24, %27 : vector<1x256xi1>
    %29 = arith.andi %28, %22 : vector<1x256xi1>
    %30 = vector.broadcast %18 : i32 to vector<1x256xi32>
    %31 = arith.addi %20, %30 : vector<1x256xi32>
    %32 = arith.select %29, %31, %20 : vector<1x256xi1>, vector<1x256xi32>
    %c0_i32_16 = arith.constant 0 : i32
    %33 = vector.broadcast %c0_i32_16 : i32 to vector<1x256xi32>
    %34 = arith.cmpi ne, %32, %33 : vector<1x256xi32>
    %35 = arith.extui %34 : vector<1x256xi1> to vector<1x256xi32>
    %36 = arith.sitofp %35 : vector<1x256xi32> to vector<1x256xf32>
    %c15_i32 = arith.constant 15 : i32
    %37 = vector.broadcast %c15_i32 : i32 to vector<1x256xi32>
    %38 = arith.cmpi ne, %32, %37 : vector<1x256xi32>
    %39 = arith.extui %38 : vector<1x256xi1> to vector<1x256xi32>
    %40 = arith.sitofp %39 : vector<1x256xi32> to vector<1x256xf32>
    %41 = vector.extract_strided_slice %15 {offsets = [0, 0], sizes = [2, 256], strides = [1, 1]} : vector<2x290xf32> to vector<2x256xf32>
    %42 = vector.broadcast %36 : vector<1x256xf32> to vector<2x256xf32>
    %43 = arith.mulf %41, %42 : vector<2x256xf32>
    %44 = vector.extract_strided_slice %15 {offsets = [0, 1], sizes = [2, 256], strides = [1, 1]} : vector<2x290xf32> to vector<2x256xf32>
    %45 = vector.extract_strided_slice %15 {offsets = [0, 2], sizes = [2, 256], strides = [1, 1]} : vector<2x290xf32> to vector<2x256xf32>
    %46 = vector.broadcast %40 : vector<1x256xf32> to vector<2x256xf32>
    %47 = arith.mulf %45, %46 : vector<2x256xf32>
    %48 = vector.extract_strided_slice %15 {offsets = [0, 16], sizes = [2, 256], strides = [1, 1]} : vector<2x290xf32> to vector<2x256xf32>
    %49 = vector.broadcast %36 : vector<1x256xf32> to vector<2x256xf32>
    %50 = arith.mulf %48, %49 : vector<2x256xf32>
    %51 = vector.extract_strided_slice %15 {offsets = [0, 17], sizes = [2, 256], strides = [1, 1]} : vector<2x290xf32> to vector<2x256xf32>
    %52 = vector.extract_strided_slice %15 {offsets = [0, 18], sizes = [2, 256], strides = [1, 1]} : vector<2x290xf32> to vector<2x256xf32>
    %53 = vector.broadcast %40 : vector<1x256xf32> to vector<2x256xf32>
    %54 = arith.mulf %52, %53 : vector<2x256xf32>
    %55 = vector.extract_strided_slice %15 {offsets = [0, 32], sizes = [2, 256], strides = [1, 1]} : vector<2x290xf32> to vector<2x256xf32>
    %56 = vector.broadcast %36 : vector<1x256xf32> to vector<2x256xf32>
    %57 = arith.mulf %55, %56 : vector<2x256xf32>
    %58 = vector.extract_strided_slice %15 {offsets = [0, 33], sizes = [2, 256], strides = [1, 1]} : vector<2x290xf32> to vector<2x256xf32>
    %59 = vector.extract_strided_slice %15 {offsets = [0, 34], sizes = [2, 256], strides = [1, 1]} : vector<2x290xf32> to vector<2x256xf32>
    %60 = vector.broadcast %40 : vector<1x256xf32> to vector<2x256xf32>
    %61 = arith.mulf %59, %60 : vector<2x256xf32>
    %62 = tpu.concatenate %43, %44, %47, %50, %51, %54, %57, %58, %61 in 0 : vector<2x256xf32>, vector<2x256xf32>, vector<2x256xf32>, vector<2x256xf32>, vector<2x256xf32>, vector<2x256xf32>, vector<2x256xf32>, vector<2x256xf32>, vector<2x256xf32> -> vector<18x256xf32>
    %c0_17 = arith.constant 0 : index
    %c0_18 = arith.constant 0 : index
    %63 = vector.load %arg4[%c0_17, %c0_18] : memref<2x18xf32, #tpu.memory_space<vmem>>, vector<2x18xf32>
    %cst_19 = arith.constant dense<0.000000e+00> : vector<2x256xf32>
    %64 = tpu.matmul %63, %62, %cst_19 {dimension_numbers = #tpu.dot_dimension_numbers<[1], [0], [0], [1], [0, 0, 1, 1], [], []>} : vector<2x18xf32>, vector<18x256xf32>, vector<2x256xf32> -> vector<2x256xf32>
    %c0_20 = arith.constant 0 : index
    %c0_21 = arith.constant 0 : index
    %65 = vector.load %arg5[%c0_20, %c0_21] : memref<2x1xf32, #tpu.memory_space<vmem>>, vector<2x1xf32>
    %66 = vector.broadcast %65 : vector<2x1xf32> to vector<2x256xf32>
    %67 = arith.addf %64, %66 : vector<2x256xf32>
    %cst_22 = arith.constant 0.000000e+00 : f32
    %68 = vector.broadcast %cst_22 : f32 to vector<2x256xf32>
    %69 = arith.maximumf %67, %68 : vector<2x256xf32>
    %c0_23 = arith.constant 0 : index
    %c0_24 = arith.constant 0 : index
    %70 = vector.load %arg6[%c0_23, %c0_24] : memref<8x2xf32, #tpu.memory_space<vmem>>, vector<8x2xf32>
    %cst_25 = arith.constant dense<0.000000e+00> : vector<8x256xf32>
    %71 = tpu.matmul %70, %69, %cst_25 {dimension_numbers = #tpu.dot_dimension_numbers<[1], [0], [0], [1], [0, 0, 1, 1], [], []>} : vector<8x2xf32>, vector<2x256xf32>, vector<8x256xf32> -> vector<8x256xf32>
    %c0_26 = arith.constant 0 : index
    %c0_27 = arith.constant 0 : index
    %72 = vector.load %arg7[%c0_26, %c0_27] : memref<8x1xf32, #tpu.memory_space<vmem>>, vector<8x1xf32>
    %73 = vector.broadcast %72 : vector<8x1xf32> to vector<8x256xf32>
    %74 = arith.addf %71, %73 : vector<8x256xf32>
    %75 = arith.addf %74, %6 : vector<8x256xf32>
    %c0_28 = arith.constant 0 : index
    %c0_29 = arith.constant 0 : index
    %c0_30 = arith.constant 0 : index
    %76 = vector.load %arg10[%c0_28, %c0_29, %c0_30] : memref<1x8x256xf32, #tpu.memory_space<vmem>>, vector<1x8x256xf32>
    %77 = vector.shape_cast %76 : vector<1x8x256xf32> to vector<8x256xf32>
    %78 = vector.shape_cast %75 : vector<8x256xf32> to vector<1x8x256xf32>
    tpu.vector_store %arg10[%c0_28, %c0_29, %c0_30], %78 {strides = array<i32>} : memref<1x8x256xf32, #tpu.memory_space<vmem>>, vector<1x8x256xf32>,
    return
  }
  func.func @transform_0(%arg0: i32) -> (i32, i32, i32) {
    %c0_i32 = arith.constant 0 : i32
    %c0_i32_0 = arith.constant 0 : i32
    %c0_i32_1 = arith.constant 0 : i32
    return %arg0, %c0_i32, %c0_i32_0 : i32, i32, i32
  }
  func.func @transform_1(%arg0: i32) -> (i32, i32) {
    %c0_i32 = arith.constant 0 : i32
    %c0_i32_0 = arith.constant 0 : i32
    %c0_i32_1 = arith.constant 0 : i32
    return %c0_i32, %c0_i32_0 : i32, i32
  }
  func.func @transform_2(%arg0: i32) -> (i32, i32) {
    %c0_i32 = arith.constant 0 : i32
    %c0_i32_0 = arith.constant 0 : i32
    %c0_i32_1 = arith.constant 0 : i32
    return %c0_i32, %c0_i32_0 : i32, i32
  }
  func.func @transform_3(%arg0: i32) -> (i32, i32) {
    %c0_i32 = arith.constant 0 : i32
    %c0_i32_0 = arith.constant 0 : i32
    %c0_i32_1 = arith.constant 0 : i32
    return %c0_i32, %c0_i32_0 : i32, i32
  }
  func.func @transform_4(%arg0: i32) -> (i32, i32) {
    %c0_i32 = arith.constant 0 : i32
    %c0_i32_0 = arith.constant 0 : i32
    %c0_i32_1 = arith.constant 0 : i32
    return %c0_i32, %c0_i32_0 : i32, i32
  }
  func.func @transform_5(%arg0: i32) -> (i32, i32) {
    %c0_i32 = arith.constant 0 : i32
    %c0_i32_0 = arith.constant 0 : i32
    %c0_i32_1 = arith.constant 0 : i32
    return %c0_i32, %c0_i32_0 : i32, i32
  }
  func.func @transform_6(%arg0: i32) -> (i32, i32) {
    %c0_i32 = arith.constant 0 : i32
    %c0_i32_0 = arith.constant 0 : i32
    %c0_i32_1 = arith.constant 0 : i32
    return %c0_i32, %c0_i32_0 : i32, i32
  }
  func.func @transform_7(%arg0: i32) -> (i32, i32) {
    %c0_i32 = arith.constant 0 : i32
    %c0_i32_0 = arith.constant 0 : i32
    %c0_i32_1 = arith.constant 0 : i32
    return %c0_i32, %c0_i32_0 : i32, i32
  }
  func.func @transform_8(%arg0: i32) -> (i32, i32) {
    %c0_i32 = arith.constant 0 : i32
    %c0_i32_0 = arith.constant 0 : i32
    %c0_i32_1 = arith.constant 0 : i32
    return %c0_i32, %c0_i32_0 : i32, i32
  }
  func.func @transform_9(%arg0: i32) -> (i32, i32, i32) {
    %c0_i32 = arith.constant 0 : i32
    %c0_i32_0 = arith.constant 0 : i32
    %c0_i32_1 = arith.constant 0 : i32
    return %arg0, %c0_i32, %c0_i32_0 : i32, i32, i32
  }
}

</mosaic_0001>

<bundles_post_ra>
// kernel: tpu_custom_call.1
= control target key start
LH: loop header
LB: loop body
LE: loop exit
PB: predicated region body
PF: predicated region fallthrough
CT: control target
= control target key end

     0   :  { %14 = vsyncpa [#allocation3], 0  ;;  %s1373_s0 = inlined_call_operand.vmem [shape: f32[2,4,256], index: 0, kind: input, shape index: {}]   ;;  %s1374_s1 = inlined_call_operand.vmem [shape: f32[2,4], index: 1, kind: input, shape index: {}]   ;;  %s1375_s2 = inlined_call_operand.vmem [shape: f32[2,1], index: 2, kind: input, shape index: {}]   ;;  %s1376_s3 = inlined_call_operand.vmem [shape: f32[2,18], index: 3, kind: input, shape index: {}]   ;;  %s1377_s4 = inlined_call_operand.vmem [shape: f32[2,1], index: 4, kind: input, shape index: {}]   ;;  %s1378_s5 = inlined_call_operand.vmem [shape: f32[8,2], index: 5, kind: input, shape index: {}]   ;;  %s1379_s6 = inlined_call_operand.vmem [shape: f32[8,1], index: 6, kind: input, shape index: {}]   ;;  %s1380_s7 = inlined_call_operand.vmem [shape: f32[8,4], index: 7, kind: input, shape index: {}]   ;;  %s1381_s8 = inlined_call_operand.vmem [shape: f32[8,1], index: 8, kind: input, shape index: {}]   ;;  %s1382_s9 = inlined_call_operand.hbm [shape: f32[2,8,256], index: 9, kind: output, shape index: {}]  }
   0x1   :  { %16 = vsyncpa [#allocation3 + $0x1], 0  ;;  %s1178_s30 = smov 0   ;;  %s1180_s10 = smov 0  }
   0x2   :  { %s1182_s11 = smov 0   ;;  %s1184_s12 = smov 0  }
   0x3 LB: > { %s1199_s13 = sadd.s32 4294967295, %s1110_s12   ;;  %s896_s14 = sadd.s32 4294967294, %s1110_s12   ;;  %s1110_s12 = sphi %s1184_s12, %s1388_s12   ;;  %s1106_s11 = sphi %s1182_s11, %s1387_s11   ;;  %s1102_s10 = sphi %s1180_s10, %s1386_s10   ;;  %s1098_s30 = sphi %s1178_s30, %s1385_s30  }
   0x4   : > { %s1203_s15 = sadd.s32 1, %s1110_s12   ;;  %s223_s16 = sadd.s32 1, %s1106_s11 }
   0x5   : > { %s220_s17 = ssub.s32 %s1110_s12, %s1203_s15  ;;  %p233_p0 = scmp.ne.s32.totalorder %s1106_s11, %s1102_s10 }
   0x6   : > { %p221_p1 = scmp.eq.s32.totalorder %s220_s17, 0  ;;  %p234_p2 = scmp.eq.s32.totalorder %s1199_s13, 1 }
   0x7   : > { %p239_p3 = scmp.ne.s32.totalorder %s1102_s10, %s1098_s30  ;;  %p240_p4 = scmp.eq.s32.totalorder %s896_s14, 1 }
   0x8   : > { %s1214_s18 = scalar_select %p221_p1, %s1106_s11, %s223_s16  }
   0x9   : > { %p1216_p5 = por %p234_p2, %p233_p0  ;;  %p1220_p6 = por %p240_p4, %p239_p3 }
   0xa   : > { %p899_p7 = scmp.ge.s32.totalorder %s1110_s12, 1  ;;  %p290_p8 = scmp.lt.s32.totalorder %s1110_s12, 3 }
   0xc   : > { %p291_p9 = pnand %p899_p7, %p290_p8 }
   0xd   : > { %p326_p10 = scmp.lt.s32.totalorder (!%p291_p9), %s1199_s13, 1  ;;  %s1114_s28 = smov (!%p291_p9), 18  }
   0xe   : > { %294 = sbr.rel (%p291_p9) target bundleno = 721 (0x2d1), region = 56  ;;  %s1115_s29 = smov (!%p291_p9), 34  }
   0xf   : > { %s1116_s17 = smov (!%p291_p9), 32   ;;  %s1117_s21 = smov (!%p291_p9), 2  }
  0x10   : > { %s1118_s22 = smov (!%p291_p9), 17   ;;  %s1121_s25 = smov (!%p291_p9), 94  }
  0x11   : > { %s1122_s26 = smov (!%p291_p9), 95   ;;  %s1126_s14 = smov (!%p291_p9), 126  }
  0x12   : > { %s1127_s16 = smov (!%p291_p9), 112  }
  0x13   : > { %v464_v0 = vlaneseq  ;;  %v1112_v1 = vmov 0   ;;  %v393_v2 = vld [vmem:[%s1375_s2] sm:$0x3]  ;;  %s327_s23 = scalar_select %p326_p10, %s1199_s13, 1  ;;  %v1113_v8 = vmov 0.0   ;;  %vm347_vm2 = vcmask 1043456  }
  0x14   : > { %985 = vset.pattern.permute.xlu0 %v1112_v1  ;;  %1046 = vset.pattern.permute.xlu1 %v1112_v1  ;;  %vm343_vm3 = vcmask 31744   ;;  %v392_v14 = vld [vmem:[%s1374_s1] sm:$0x3]  ;;  %vm457_vm6 = vcmask 138240   ;;  %vm561_vm7 = vcmask 277504   ;;  %vm537_vm8 = vcmask 146432  }
  0x15   : > { %396 = vperm.xlu0 %985, %v393_v2   ;;  %v465_v3 = vand.u32 127, %v464_v0  ;;  %1047 = vset.pattern.permute.xlu2 %v1112_v1  ;;  %s928_s24 = sshll.u32 %s327_s23, 3  ;;  %s1119_s23 = smov 16   ;;  %vm549_vm9 = vcmask 261120   ;;  %vm511_vm10 = vcmask 15360   ;;  %vm525_vm11 = vcmask 130048  }
  0x16   : > { %s330_s27 = scalar_lea.vmem %s1373_s0, %s928_s24  ;;  %s1120_s24 = smov 111   ;;  %vm687_vm12 = vcmask 769024   ;;  %vm690_vm13 = vcmask 1041408   ;;  %vm642_vm14 = vcmask 900096   ;;  %vm625_vm15 = vcmask 908288  }
  0x17   : > { %v466_v4 = vadd.s32 128, %v465_v3  ;;  %v471_v5 = vand.u32 15, %v465_v3  ;;  %v331_v6 = vld [vmem:[%s330_s27] sm:$0xff]  ;;  %s1123_s27 = smov 127  }
  0x18   : > { %340 = vst [vmem:[#allocation1] ss:$2 sm:$0xff] %v331_v6 }
  0x19   : > { %v478_v7 = vand.u32 15, %v466_v4  ;;  %vm497_vm0 = vcmp.ne.s32.totalorder %v471_v5, 15  ;;  %vm491_vm4 = vcmp.ne.s32.totalorder %v471_v5, 0 }
  0x1a   : > { %v913_v9 = vsel %vm497_vm0, 1.0, %v1113_v8  ;;  %v1243_v17 = vsel %vm491_vm4, 1.0, %v1113_v8  ;;  %vm659_vm0 = vcmask 785408   ;;  %vm580_vm4 = vcmask 1039360  }
  0x1b   : > { %vm498_vm1 = vcmp.ne.s32.totalorder %v478_v7, 15  ;;  %vm492_vm5 = vcmp.ne.s32.totalorder %v478_v7, 0 }
  0x1c   : > { %v914_v10 = vsel %vm498_vm1, 1.0, %v1113_v8  ;;  %v1245_v18 = vsel %vm492_vm5, 1.0, %v1113_v8  ;;  %vm673_vm1 = vcmask 777216   ;;  %vm597_vm5 = vcmask 1031168  }
  0x1d   : > { %v986_v11 = vpack.i.bf16 %v914_v10, %v913_v9  ;;  %v991_v19 = vpack.i.bf16 %v1245_v18, %v1243_v17 }
  0x1f   : > { %987 = vrot.lane.b32.xlu1 %v986_v11, %s1114_s28  ;;  %1002 = vrot.lane.b32.xlu0 %v986_v11, %s1115_s29  ;;  %v341_v12 = vld.sshfl [vmem:[#allocation1] sm:$0xff pattern:$0x75316420]  ;;  %v342_v13 = vld.sshfl [vmem:[#allocation1 + $0x8] sm:$0xff pattern:$0x75316420] }
  0x20   : > { %399 = vst [vmem:[#allocation1] ss:$2 sm:$0xff] %v331_v6  ;;  %903 = vmatpush.msk.msra.mxu0 %vm347_vm2, %v341_v12  ;;  %905 = vmatpush.msk.msra.mxu1 %vm347_vm2, %v342_v13  ;;  %s1124_s28 = smov 110   ;;  %s1125_s29 = smov 96  }
  0x21   : > { %992 = vrot.lane.b32.xlu2 %v991_v19, %s1116_s17  ;;  %s323_s17 = sand.u32 1, %s1102_s10  }
  0x27   : > { %v400_v15 = vld.sshfl [vmem:[#allocation1] sm:$0xff pattern:$0x75316420]  ;;  %v401_v16 = vld.sshfl [vmem:[#allocation1 + $0x8] sm:$0xff pattern:$0x75316420] }
  0x28   : > { %907 = vmatpush.msk.msra.mxu2 %vm347_vm2, %v400_v15  ;;  %909 = vmatpush.msk.msra.mxu3 %vm347_vm2, %v401_v16 }
  0x29   : > { %908 = vmatmul.msk.f32.vlgmr.msra.gmra.mxu2 %vm343_vm3, %v392_v14  ;;  %910 = vmatmul.msk.f32.vlgmr.msra.gmra.mxu3 %vm343_vm3, %v392_v14 }
  0x2a   : > { %997 = vrot.lane.b32.xlu2 %v986_v11, %s1117_s21  ;;  %s900_s21 = sshll.u32 %s323_s17, 4 }
  0x7b   : > { %v993_v38 = vpop.permute.xlu2 %992 }
  0x7c   : > { %v995_v45 = vunpack.i.h.bf16 %v993_v38  ;;  %v994_v46 = vunpack.i.l.bf16 %v993_v38 }
  0x7e   : > { %v550_v52 = vsel %vm549_vm9, %v994_v46, %v995_v45 }
  0x84   : > { %v998_v53 = vpop.permute.xlu2 %997 }
  0x85   : > { %v1000_v61 = vunpack.i.h.bf16 %v998_v53  ;;  %v999_v62 = vunpack.i.l.bf16 %v998_v53 }
  0x87   : > { %v397_v20 = vpop.permute.xlu0 %396  ;;  %v512_v3 = vsel %vm511_vm10, %v999_v62, %v1000_v61 }
  0x91   : > { %v1249_v27 = vpop.permute.xlu1 %987  ;;  %v1003_v28 = vpop.permute.xlu0 %1002 }
  0x92   : > { %v1005_v29 = vunpack.i.h.bf16 %v1003_v28  ;;  %v1004_v32 = vunpack.i.l.bf16 %v1003_v28  ;;  %v990_v39 = vunpack.i.h.bf16 %v1249_v27  ;;  %v989_v40 = vunpack.i.l.bf16 %v1249_v27 }
  0x94   : > { %v562_v41 = vsel %vm561_vm7, %v1004_v32, %v1005_v29  ;;  %v538_v47 = vsel %vm537_vm8, %v989_v40, %v990_v39 }
  0xac   : > { %v426_v21 = vpop.f32.mrf.mxu2  ;;  %v446_v22 = vpop.f32.mrf.mxu3 }
  0xad   : > { %v427_v23 = vadd.f32 %v426_v21, %v397_v20  ;;  %v447_v24 = vadd.f32 %v446_v22, %v397_v20 }
  0xaf   : > { %v449_v25 = vmax.f32 %v427_v23, 0.0  ;;  %v450_v26 = vmax.f32 %v447_v24, 0.0 }
  0xb1   : > { %455 = vrot.lane.b32.xlu1 %v450_v26, %s1118_s22  ;;  %453 = vrot.lane.b32.xlu0 %v449_v25, %s1118_s22  ;;  %s929_s22 = sshll.u32 %s1199_s13, 4  ;;  %s821_s13 = scalar_lea.sflag [#allocation3], %s323_s17 }
  0xb9   : > { %1007 = vrot.lane.b32.xlu1 %v991_v19, %s1119_s23 }
 0x123   : > { %v456_v30 = vpop.permute.xlu1 %455  ;;  %v454_v31 = vpop.permute.xlu0 %453 }
 0x124   : > { %v1251_v33 = vsel %vm457_vm6, %v456_v30, 0.0  ;;  %v1253_v34 = vsel %vm457_vm6, %v454_v31, %v456_v30  ;;  %v1255_v35 = vsel %vm457_vm6, 0.0, %v454_v31  ;;  %v761_v30 = vld [vmem:[%s1379_s6] sm:$0xff]  ;;  %vm614_vm6 = vcmask 916480  }
 0x125   : > { %623 = vrot.lane.b32.xlu0 %v1251_v33, %s1120_s24  ;;  %v568_v36 = vmul.f32 %v1005_v29, %v1251_v33  ;;  %v1011_v37 = vpack.i.bf16 %v1253_v34, %v1255_v35  ;;  %v664_v42 = vrot.slane %v1255_v35, 2  ;;  %v665_v43 = vrot.slane %v1253_v34, 2 }
 0x126   : > { %v567_v44 = vmul.f32 %v562_v41, %v1253_v34  ;;  %v566_v48 = vmul.f32 %v1004_v32, %v1255_v35  ;;  %v542_v50 = vmul.f32 %v989_v40, %v1255_v35  ;;  %v543_v51 = vmul.f32 %v538_v47, %v1253_v34 }
 0x127   : > { %685 = vrot.lane.b32.xlu1 %v568_v36, %s1121_s25  ;;  %1012 = vrot.lane.b32.xlu2 %v1011_v37, %s1120_s24  ;;  %v1021_v49 = vpack.i.bf16 %v665_v43, %v664_v42  ;;  %v571_v54 = vrot.slane %v1255_v35, 6  ;;  %v572_v55 = vrot.slane %v1253_v34, 6  ;;  %v573_v58 = vrot.slane %v1251_v33, 6 }
 0x128   : > { %v633_v56 = vrot.slane %v542_v50, 6  ;;  %v634_v57 = vrot.slane %v543_v51, 6  ;;  %v554_v59 = vmul.f32 %v994_v46, %v1255_v35  ;;  %v555_v60 = vmul.f32 %v550_v52, %v1253_v34  ;;  %v333_v46 = vld [vmem:[%s1381_s8] sm:$0xff] }
 0x129   : > { %v1016_v63 = vpack.i.bf16 %v572_v55, %v571_v54  ;;  %v556_v4 = vmul.f32 %v995_v45, %v1251_v33  ;;  %v516_v7 = vmul.f32 %v999_v62, %v1255_v35  ;;  %v517_v8 = vmul.f32 %v512_v3, %v1253_v34  ;;  %v705_v45 = vld [vmem:[%s1377_s4] sm:$0x3] }
 0x12a   : > { %v1026_v0 = vpack.i.bf16 %v634_v57, %v633_v56  ;;  %v650_v1 = vrot.slane %v554_v59, 4  ;;  %v651_v2 = vrot.slane %v555_v60, 4  ;;  %v666_v9 = vrot.slane %v1251_v33, 2 }
 0x12b   : > { %v1008_v5 = vpop.permute.xlu1 %1007  ;;  %v652_v10 = vrot.slane %v556_v4, 4  ;;  %v588_v13 = vrot.slane %v516_v7, 4  ;;  %v589_v14 = vrot.slane %v517_v8, 4  ;;  %v544_v15 = vmul.f32 %v990_v39, %v1251_v33 }
 0x12c   : > { %v1031_v6 = vpack.i.bf16 %v651_v2, %v650_v1  ;;  %v1010_v11 = vunpack.i.h.bf16 %v1008_v5  ;;  %v1009_v12 = vunpack.i.l.bf16 %v1008_v5  ;;  %v518_v16 = vmul.f32 %v1000_v61, %v1251_v33 }
 0x12d   : > { %683 = vrot.lane.b32.xlu0 %v567_v44, %s1121_s25  ;;  %v1036_v20 = vpack.i.bf16 %v589_v14, %v588_v13  ;;  %v635_v22 = vrot.slane %v544_v15, 6 }
 0x12e   : > { %v526_v19 = vsel %vm525_vm11, %v1009_v12, %v1010_v11  ;;  %v530_v21 = vmul.f32 %v1009_v12, %v1255_v35  ;;  %v590_v23 = vrot.slane %v518_v16, 4  ;;  %v532_v25 = vmul.f32 %v1010_v11, %v1251_v33  ;;  %v332_v33 = vld [vmem:[%s1380_s7] sm:$0xff] }
 0x12f   : > { %681 = vrot.lane.b32.xlu2 %v566_v48, %s1121_s25  ;;  %1022 = vrot.lane.b32.xlu1 %v1021_v49, %s1122_s26  ;;  %v531_v24 = vmul.f32 %v526_v19, %v1253_v34  ;;  %s832_s25 = scalar_lea.hbm %s1382_s9, %s929_s22  ;;  %s1068_s22 = scalar_lea.hbm %s1382_s9, 32 }
 0x130   : > { %v605_v26 = vrot.slane %v530_v21, 2  ;;  %v607_v28 = vrot.slane %v532_v25, 2  ;;  %904 = vmatmul.msk.f32.vlgmr.msra.gmra.mxu0 %vm343_vm3, %v332_v33  ;;  %906 = vmatmul.msk.f32.vlgmr.msra.gmra.mxu1 %vm343_vm3, %v332_v33  ;;  %vm695_vm3 = vcmask 1045504  }
 0x131   : > { %v606_v27 = vrot.slane %v531_v24, 2 }
 0x133   : > { %v1041_v29 = vpack.i.bf16 %v606_v27, %v605_v26  ;;  %v704_v26 = vld [vmem:[%s1376_s3] sm:$0x3] }
 0x135   : > { %578 = vrot.lane.b32.xlu0 %v573_v58, %s1123_s27 }
 0x137   : > { %1017 = vrot.lane.b32.xlu2 %v1016_v63, %s1123_s27  ;;  %1027 = vrot.lane.b32.xlu1 %v1026_v0, %s1124_s28 }
 0x13d   : > { %1032 = vrot.lane.b32.xlu0 %v1031_v6, %s1125_s29 }
 0x13f   : > { %671 = vrot.lane.b32.xlu2 %v666_v9, %s1122_s26  ;;  %657 = vrot.lane.b32.xlu1 %v652_v10, %s1125_s29  ;;  %s325_s26 = scalar_lea.vmem [#allocation2], %s900_s21 }
 0x140   : > { %s834_s27 = sshll.u32 %s325_s26, 4  ;;  %s835_s27 = int_to_ptr.vmem [resolvable:$true] %s834_s27 }
 0x145   : > { %1037 = vrot.lane.b32.xlu0 %v1036_v20, %s1126_s14  ;;  %v503_v20 = vmul.f32 %v1243_v17, %v1255_v35 }
 0x147   : > { %640 = vrot.lane.b32.xlu2 %v635_v22, %s1124_s28  ;;  %595 = vrot.lane.b32.xlu1 %v590_v23, %s1126_s14  ;;  %s836_s28 = sshll.u32 %s832_s25, 4  ;;  %s837_s28 = int_to_ptr.hbm [resolvable:$true] %s836_s28 }
 0x148   : > { %s1062_s29 = sshra.s32 %s837_s28, 4  ;;  %s1063_s29 = int_to_ptr.hbm [resolvable:$true] %s1062_s29 }
 0x149   : > { %s1064_s14 = scalar_lea.hbm %s1063_s29, 16  ;;  %p1069_p0 = scmp.lt.s32.totalorder %s1063_s29, %s1382_s9 }
 0x14a   : > { %p1065_p11 = scmp.ne.s32.totalorder %s1063_s29, %s1064_s14  ;;  %p1070_p1 = scmp.lt.s32.totalorder %s1068_s22, %s1064_s14 }
 0x14c   : > { %p1066_p12 = pnand %p1065_p11, %p1216_p5  ;;  %p1071_p2 = por %p1070_p1, %p1069_p0 }
 0x14d   : > { %612 = vrot.lane.b32.xlu0 %v607_v28, %s1127_s16 }
 0x14e   : > { %p1067_p13 = pneg %p1066_p12 }
 0x14f   : > { %1042 = vrot.lane.b32.xlu2 %v1041_v29, %s1127_s16  ;;  %708 = vperm.xlu1 %1046, %v705_v45   ;;  %v504_v29 = vmul.f32 %v1245_v18, %v1253_v34 }
 0x150   : > { %p1072_p3 = pnand %p1071_p2, %p1067_p13 }
 0x155   : > { %764 = vperm.xlu0 %985, %v761_v30  }
 0x157   : > { %336 = vperm.xlu2 %1047, %v333_v46  }
 0x181   : > { %v1013_v31 = vpop.permute.xlu2 %1012 }
 0x182   : > { %v1015_v51 = vunpack.i.h.bf16 %v1013_v31  ;;  %v1014_v52 = vunpack.i.l.bf16 %v1013_v31 }
 0x184   : > { %v626_v58 = vsel %vm625_vm15, %v1014_v52, %v1015_v51 }
 0x189   : > { %v682_v32 = vpop.permute.xlu2 %681 }
 0x191   : > { %v1295_v36 = vpop.permute.xlu2 %1017 }
 0x192   : > { %v1020_v61 = vunpack.i.h.bf16 %v1295_v36  ;;  %v1019_v62 = vunpack.i.l.bf16 %v1295_v36 }
 0x194   : > { %v581_v12 = vsel %vm580_vm4, %v1019_v62, %v1020_v61 }
 0x195   : > { %v691_v23 = vsel %vm690_vm13, %v503_v20, %v581_v12 }
 0x197   : > { %v624_v37 = vpop.permute.xlu0 %623 }
 0x198   : > { %v627_v63 = vsel %vm625_vm15, %v1015_v51, %v624_v37 }
 0x199   : > { %v686_v38 = vpop.permute.xlu1 %685  ;;  %v672_v40 = vpop.permute.xlu2 %671 }
 0x19f   : > { %v684_v39 = vpop.permute.xlu0 %683 }
 0x1a0   : > { %v688_v41 = vsel %vm687_vm12, %v682_v32, %v684_v39  ;;  %v689_v42 = vsel %vm687_vm12, %v684_v39, %v686_v38 }
 0x1a1   : > { %v1023_v43 = vpop.permute.xlu1 %1022  ;;  %915 = vmatpush.msk.msrb.mxu0 %vm690_vm13, %v688_v41  ;;  %917 = vmatpush.msk.msrb.mxu1 %vm690_vm13, %v689_v42  ;;  %v641_v48 = vpop.permute.xlu2 %640 }
 0x1a2   : > { %v1025_v53 = vunpack.i.h.bf16 %v1023_v43  ;;  %v1024_v54 = vunpack.i.l.bf16 %v1023_v43 }
 0x1a4   : > { %v674_v5 = vsel %vm673_vm1, %v1024_v54, %v1025_v53  ;;  %v675_v7 = vsel %vm673_vm1, %v1025_v53, %v672_v40  ;;  %v760_v40 = vld [vmem:[%s1378_s5] sm:$0xff] }
 0x1a7   : > { %v579_v44 = vpop.permute.xlu0 %578 }
 0x1a8   : > { %v582_v27 = vsel %vm580_vm4, %v1020_v61, %v579_v44 }
 0x1a9   : > { %v1028_v47 = vpop.permute.xlu1 %1027  ;;  %v1043_v9 = vpop.permute.xlu2 %1042  ;;  %v692_v35 = vsel %vm690_vm13, %v504_v29, %v582_v27 }
 0x1aa   : > { %v1030_v49 = vunpack.i.h.bf16 %v1028_v47  ;;  %v1029_v50 = vunpack.i.l.bf16 %v1028_v47  ;;  %v1045_v13 = vunpack.i.h.bf16 %v1043_v9  ;;  %v1044_v14 = vunpack.i.l.bf16 %v1043_v9 }
 0x1ac   : > { %v644_v55 = vsel %vm642_vm14, %v1030_v49, %v641_v48  ;;  %v643_v56 = vsel %vm642_vm14, %v1029_v50, %v1030_v49  ;;  %v615_v24 = vsel %vm614_vm6, %v1044_v14, %v1045_v13 }
 0x1ad   : > { %v698_v3 = vsel %vm690_vm13, %v626_v58, %v643_v56  ;;  %v699_v4 = vsel %vm690_vm13, %v627_v63, %v644_v55  ;;  %v369_v36 = vpop.f32.mrf.mxu0  ;;  %v389_v37 = vpop.f32.mrf.mxu1 }
 0x1af   : > { %v1033_v57 = vpop.permute.xlu0 %1032 }
 0x1b0   : > { %v1035_v59 = vunpack.i.h.bf16 %v1033_v57  ;;  %v1034_v60 = vunpack.i.l.bf16 %v1033_v57 }
 0x1b1   : > { %v658_v0 = vpop.permute.xlu1 %657  ;;  %v337_v44 = vpop.permute.xlu2 %336 }
 0x1b2   : > { %v661_v1 = vsel %vm659_vm0, %v1035_v59, %v658_v0  ;;  %v660_v2 = vsel %vm659_vm0, %v1034_v60, %v1035_v59  ;;  %v370_v47 = vadd.f32 %v369_v36, %v337_v44  ;;  %v390_v51 = vadd.f32 %v389_v37, %v337_v44 }
 0x1b3   : > { %v700_v6 = vsel %vm347_vm2, %v698_v3, %v660_v2  ;;  %v701_v8 = vsel %vm347_vm2, %v699_v4, %v661_v1 }
 0x1b4   : > { %v702_v10 = vsel %vm695_vm3, %v700_v6, %v674_v5  ;;  %v703_v11 = vsel %vm695_vm3, %v701_v8, %v675_v7 }
 0x1b5   : > { %732 = vmatpush.msrb.mxu0 %v702_v10  ;;  %752 = vmatpush.msrb.mxu1 %v703_v11 }
 0x1b7   : > { %v1038_v15 = vpop.permute.xlu0 %1037 }
 0x1b8   : > { %v1040_v16 = vunpack.i.h.bf16 %v1038_v15  ;;  %v1039_v19 = vunpack.i.l.bf16 %v1038_v15 }
 0x1b9   : > { %v596_v21 = vpop.permute.xlu1 %595 }
 0x1ba   : > { %v598_v22 = vsel %vm597_vm5, %v1039_v19, %v1040_v16  ;;  %v599_v17 = vsel %vm597_vm5, %v1040_v16, %v596_v21 }
 0x1bb   : > { %v693_v25 = vsel %vm347_vm2, %v691_v23, %v598_v22  ;;  %v694_v32 = vsel %vm347_vm2, %v692_v35, %v599_v17 }
 0x1bc   : > { %v696_v28 = vsel %vm695_vm3, %v693_v25, %v615_v24 }
 0x1bd   : > { %733 = vmatpush.msrb.mxu0 %v696_v28 }
 0x1be   : > { %916 = vmatmul.msk.f32.vlgmr.msrb.gmra.mxu0 %vm537_vm8, %v704_v26 }
 0x1bf   : > { %v613_v30 = vpop.permute.xlu0 %612 }
 0x1c0   : > { %v616_v31 = vsel %vm614_vm6, %v1045_v13, %v613_v30 }
 0x1c1   : > { %v697_v33 = vsel %vm695_vm3, %v694_v32, %v616_v31  ;;  %v709_v18 = vpop.permute.xlu1 %708 }
 0x1c2   : > { %753 = vmatpush.msrb.mxu1 %v697_v33 }
 0x1c3   : > { %918 = vmatmul.msk.f32.vlgmr.msrb.gmra.mxu1 %vm537_vm8, %v704_v26 }
 0x1c7   : > { %v765_v45 = vpop.permute.xlu0 %764 }
 0x23b   : > { %v735_v34 = vpop.f32.mrf.mxu0 }
 0x23c   : > { %v736_v38 = vadd.f32 %v735_v34, %v709_v18 }
 0x23e   : > { %v758_v39 = vmax.f32 %v736_v38, 0.0 }
 0x240   : > { %v755_v41 = vpop.f32.mrf.mxu1  ;;  %919 = vmatpush.msk.msrb.mxu2 %vm690_vm13, %v758_v39 }
 0x241   : > { %v756_v42 = vadd.f32 %v755_v41, %v709_v18  ;;  %920 = vmatmul.msk.f32.vlgmr.msrb.gmra.mxu2 %vm511_vm10, %v760_v40 }
 0x243   : > { %v759_v43 = vmax.f32 %v756_v42, 0.0 }
 0x245   : > { %921 = vmatpush.msk.msrb.mxu3 %vm690_vm13, %v759_v43 }
 0x246   : > { %922 = vmatmul.msk.f32.vlgmr.msrb.gmra.mxu3 %vm511_vm10, %v760_v40 }
 0x2c4   : > { %v793_v46 = vpop.f32.mrf.mxu2 }
 0x2c5   : > { %v794_v48 = vadd.f32 %v793_v46, %v765_v45 }
 0x2c7   : > { %v816_v49 = vadd.f32 %v794_v48, %v370_v47 }
 0x2c9   : > { %818 = vst [vmem:[%s325_s26] sm:$0xff] %v816_v49  ;;  %v813_v50 = vpop.f32.mrf.mxu3 }
 0x2ca   : > { %v814_v52 = vadd.f32 %v813_v50, %v765_v45 }
 0x2cc   : > { %v817_v53 = vadd.f32 %v814_v52, %v390_v51 }
 0x2ce   : > { %819 = vst [vmem:[%s325_s26 + $0x8] sm:$0xff] %v817_v53 }
 0x2cf   : > { %1075 = shalt.err (!%p1072_p3)
}
 0x2d0   : > { %930 = dma.vmem_to_hbm [thread:$0]  (%p1216_p5), %s835_s27, 256, %s837_s28, %s821_s13  }
 0x2d1 PF: > { %p936_p4 = scmp.ge.s32.totalorder %s1110_s12, 2  ;;  %s848_s17 = sand.u32 1, %s1098_s30  }
 0x2d2   : > { %s849_s25 = scalar_lea.sflag [#allocation3], %s848_s17 }
 0x2d3   : > { %p933_p7 = pnand %p936_p4, %p1220_p6 }
 0x2d5   : > { %p934_p8 = pneg %p933_p7 }
 0x2d7   : > { %1093 = dma.done.wait (%p934_p8), %s849_s25, 256  }
 0x2d8   : > { %1095 = vsyncadd (%p934_p8), %s849_s25, 4294967040  ;;  %p19_p9 = scmp.ge.s32.totalorder %s1203_s15, 4   ;;  %s1385_s30 = smov %s1102_s10 }
 0x2d9   : > { %s1386_s10 = smov %s1106_s11  ;;  %s1387_s11 = smov %s1214_s18 }
 0x2da   : > { %s1388_s12 = smov %s1203_s15  ;;  %21 = sbr.rel (!%p19_p9) target bundleno = 3 (0x3), region = 91 }
 0x2df   :  { %855 = vsyncpa [#allocation3], 1 }
 0x2e0   :  { %857 = vsyncpa [#allocation3 + $0x1], 1 }

</bundles_post_ra>
